<compile_context>
chip_gen: v7x
topology: tpu7x:2x2x1
jax: 0.10.0
libtpu: 0.0.40
codegen_flags: <defaults>
</compile_context>

<pallas_src>
import jax
import jax.numpy as jnp
from jax.experimental import pallas as pl
from jax.experimental.pallas import tpu as pltpu

EPS = 1e-6


def _sublayer_connection_kernel(x_ref, a2_ref, b2_ref, w_ref, bias_ref, o_ref):
    # x_ref: (TR, D)        a2/b2/bias: (1, D) f32, VMEM-resident
    # w_ref: (D, D), VMEM-resident
    xf = x_ref[...].astype(jnp.float32)          # no-op when x is already f32
    d = xf.shape[-1]

    # --- LayerNorm stats, one pass (two independent cross-lane reductions) ---
    s = jnp.sum(xf, axis=-1, keepdims=True)
    ss = jnp.sum(xf * xf, axis=-1, keepdims=True)
    mean = s * (1.0 / d)
    # torch-style unbiased variance (n-1); clamp tiny negative from cancellation
    var = jnp.maximum(ss - s * mean, 0.0) * (1.0 / (d - 1))
    inv = pl.reciprocal(jnp.sqrt(var) + EPS, approx=False)   # exact; EUP has slack

    # --- LayerNorm affine in-kernel (hides under DMA/MXU) ---
    normed = (xf - mean) * inv * a2_ref[...] + b2_ref[...]

    # --- fused sublayer: Linear(size, size) on the MXU, f32 accumulator ---
    y = jnp.dot(normed.astype(w_ref.dtype), w_ref[...],
                preferred_element_type=jnp.float32)
    y = y + bias_ref[...]

    # --- dropout (eval mode = identity) + residual add ---
    # TODO(synk): train-mode dropout masking not implemented.
    o_ref[...] = (xf + y).astype(o_ref.dtype)


def sublayer_connection(x, a2, b2, w, bias, *, tile_rows=512):
    """x: (B, S, D). Returns x + Linear(LayerNorm(x)); same shape/dtype as x."""
    B, S, D = x.shape
    R = B * S
    x2 = x.reshape(R, D)                              # reshape only; no pad/copy

    a2r = a2.reshape(1, D).astype(jnp.float32)
    b2r = b2.reshape(1, D).astype(jnp.float32)
    biasr = bias.reshape(1, D).astype(jnp.float32)

    # Row-tile alignment from dtype sublane packing: 8 (4B), 16 (2B), 32 (1B).
    align = 8 * max(1, 4 // x2.dtype.itemsize)
    # Cap TR at ceil(R/2) (aligned up) so the row grid has >= 2 steps:
    # megacore sharding on v7x + actual DMA/compute overlap everywhere.
    half_aligned = -(-(-(-R // 2)) // align) * align
    TR = max(align, min(tile_rows, half_aligned))
    grid_rows = pl.cdiv(R, TR)   # ragged tail: boundary block, OOB writes dropped

    # VMEM budget with true buffer counts:
    #   single-buffered resident W + 3 vectors, double-buffered x/out row tiles.
    est = (D * D * w.dtype.itemsize
           + 3 * D * 4
           + 2 * TR * D * x2.dtype.itemsize
           + 2 * TR * D * x2.dtype.itemsize)
    try:
        phys = int(pltpu.get_tpu_info().vmem_capacity_bytes)
    except Exception:
        phys = 64 << 20                               # conservative (v7x per-TC)
    vmem_limit = min(int(phys * 0.9), max(int(est * 1.5), 24 << 20))

    resident = dict(pipeline_mode=pl.Buffered(1))     # constant index_map blocks

    out = pl.pallas_call(
        _sublayer_connection_kernel,
        out_shape=jax.ShapeDtypeStruct((R, D), x.dtype),
        grid_spec=pltpu.PrefetchScalarGridSpec(
            num_scalar_prefetch=0,
            grid=(grid_rows,),
            in_specs=[
                pl.BlockSpec((TR, D), lambda i: (i, 0)),               # x: row-tiled
                pl.BlockSpec((1, D), lambda i: (0, 0), **resident),    # a2
                pl.BlockSpec((1, D), lambda i: (0, 0), **resident),    # b2
                pl.BlockSpec((D, D), lambda i: (0, 0), **resident),    # W
                pl.BlockSpec((1, D), lambda i: (0, 0), **resident),    # bias
            ],
            out_specs=pl.BlockSpec((TR, D), lambda i: (i, 0)),
        ),
        compiler_params=pltpu.CompilerParams(
            dimension_semantics=("parallel",),   # rows independent -> megacore
            vmem_limit_bytes=vmem_limit,
        ),
    )(x2, a2r, b2r, w, biasr)

    return out.reshape(B, S, D)


def reference(x, a2, b2, w, bias):
    # Pure-JAX f32 reference with the original (torch-style) semantics.
    x32 = x.astype(jnp.float32)
    mean = jnp.mean(x32, axis=-1, keepdims=True)
    diff = x32 - mean
    var_unbiased = jnp.sum(diff * diff, axis=-1, keepdims=True) / (x.shape[-1] - 1)
    std = jnp.sqrt(var_unbiased)
    normed = a2 * diff / (std + EPS) + b2
    y = jnp.dot(normed, w.astype(jnp.float32),
                precision=jax.lax.Precision.HIGHEST) + bias
    return (x32 + y).astype(x.dtype)


if __name__ == "__main__":
    # Small but lane-dense shapes: batch=2, seq=64, size(hidden)=128.
    B, S, D = 2, 64, 128

    key = jax.random.PRNGKey(0)
    kx, kw, kb, ka, kb2 = jax.random.split(key, 5)

    x = jax.random.normal(kx, (B, S, D), dtype=jnp.float32)

    # Non-trivial LayerNorm affine (module init is ones/zeros; trained values
    # are arbitrary) so the in-kernel affine path is actually exercised.
    a2 = 1.0 + 0.1 * jax.random.normal(ka, (D,), dtype=jnp.float32)
    b2 = 0.1 * jax.random.normal(kb2, (D,), dtype=jnp.float32)

    # Deterministic fused sublayer (Linear(size, size)) params.
    w = jax.random.normal(kw, (D, D), dtype=jnp.float32) * (1.0 / jnp.sqrt(D))
    bias = jax.random.normal(kb, (D,), dtype=jnp.float32) * 0.01

    out = sublayer_connection(x, a2, b2, w, bias)
    out = jax.block_until_ready(out)

    ref = reference(x, a2, b2, w, bias)
    assert out.shape == (B, S, D)
    # MXU matmul rounding vs f32-highest reference -> modest tolerance.
    assert jnp.allclose(out, ref, atol=3e-2, rtol=3e-2), "mismatch vs reference"

    print("KERNEL_OK")
</pallas_src>

<mosaic_0001>
module attributes {stable_mosaic.version = 11 : i64} {
  func.func @_sublayer_connection_kernel(%arg0: i32, %arg1: memref<64x128xf32, #tpu.memory_space<vmem>>, %arg2: memref<1x128xf32, #tpu.memory_space<vmem>>, %arg3: memref<1x128xf32, #tpu.memory_space<vmem>>, %arg4: memref<128x128xf32, #tpu.memory_space<vmem>>, %arg5: memref<1x128xf32, #tpu.memory_space<vmem>>, %arg6: memref<64x128xf32, #tpu.memory_space<vmem>>) attributes {dimension_semantics = [#tpu.dimension_semantics<parallel>], iteration_bounds = array<i64: 2>, scalar_prefetch = 0 : i64, scratch_operands = 0 : i64, tpu.core_type = #tpu.core_type<tc>, window_params = [{transform_indices = @transform_0, window_bounds = array<i64: 64, 128>}, {pipeline_mode = #tpu.pipeline_mode<synchronous>, transform_indices = @transform_1, window_bounds = array<i64: 1, 128>}, {pipeline_mode = #tpu.pipeline_mode<synchronous>, transform_indices = @transform_2, window_bounds = array<i64: 1, 128>}, {pipeline_mode = #tpu.pipeline_mode<synchronous>, transform_indices = @transform_3, window_bounds = array<i64: 128, 128>}, {pipeline_mode = #tpu.pipeline_mode<synchronous>, transform_indices = @transform_4, window_bounds = array<i64: 1, 128>}, {transform_indices = @transform_5, window_bounds = array<i64: 64, 128>}]} {
    %c0 = arith.constant 0 : index
    %c0_0 = arith.constant 0 : index
    %0 = vector.load %arg1[%c0, %c0_0] : memref<64x128xf32, #tpu.memory_space<vmem>>, vector<64x128xf32>
    %cst = arith.constant dense<0.000000e+00> : vector<64xf32>
    %1 = vector.multi_reduction <add>, %0, %cst [1] : vector<64x128xf32> to vector<64xf32>
    %2 = vector.shape_cast %1 : vector<64xf32> to vector<64x1xf32>
    %3 = arith.mulf %0, %0 : vector<64x128xf32>
    %cst_1 = arith.constant dense<0.000000e+00> : vector<64xf32>
    %4 = vector.multi_reduction <add>, %3, %cst_1 [1] : vector<64x128xf32> to vector<64xf32>
    %5 = vector.shape_cast %4 : vector<64xf32> to vector<64x1xf32>
    %cst_2 = arith.constant 7.812500e-03 : f32
    %6 = vector.broadcast %cst_2 : f32 to vector<64x1xf32>
    %7 = arith.mulf %2, %6 : vector<64x1xf32>
    %8 = arith.mulf %2, %7 : vector<64x1xf32>
    %9 = arith.subf %5, %8 : vector<64x1xf32>
    %cst_3 = arith.constant 0.000000e+00 : f32
    %10 = vector.broadcast %cst_3 : f32 to vector<64x1xf32>
    %11 = arith.maximumf %9, %10 : vector<64x1xf32>
    %cst_4 = arith.constant 0.00787401571 : f32
    %12 = vector.broadcast %cst_4 : f32 to vector<64x1xf32>
    %13 = arith.mulf %11, %12 : vector<64x1xf32>
    %14 = math.sqrt %13 : vector<64x1xf32>
    %cst_5 = arith.constant 9.99999997E-7 : f32
    %15 = vector.broadcast %cst_5 : f32 to vector<64x1xf32>
    %16 = arith.addf %14, %15 : vector<64x1xf32>
    %17 = tpu.reciprocal %16 : vector<64x1xf32> -> vector<64x1xf32>
    %18 = vector.broadcast %7 : vector<64x1xf32> to vector<64x128xf32>
    %19 = arith.subf %0, %18 : vector<64x128xf32>
    %20 = vector.broadcast %17 : vector<64x1xf32> to vector<64x128xf32>
    %21 = arith.mulf %19, %20 : vector<64x128xf32>
    %c0_6 = arith.constant 0 : index
    %c0_7 = arith.constant 0 : index
    %22 = vector.load %arg2[%c0_6, %c0_7] : memref<1x128xf32, #tpu.memory_space<vmem>>, vector<1x128xf32>
    %23 = vector.broadcast %22 : vector<1x128xf32> to vector<64x128xf32>
    %24 = arith.mulf %21, %23 : vector<64x128xf32>
    %c0_8 = arith.constant 0 : index
    %c0_9 = arith.constant 0 : index
    %25 = vector.load %arg3[%c0_8, %c0_9] : memref<1x128xf32, #tpu.memory_space<vmem>>, vector<1x128xf32>
    %26 = vector.broadcast %25 : vector<1x128xf32> to vector<64x128xf32>
    %27 = arith.addf %24, %26 : vector<64x128xf32>
    %c0_10 = arith.constant 0 : index
    %c0_11 = arith.constant 0 : index
    %28 = vector.load %arg4[%c0_10, %c0_11] : memref<128x128xf32, #tpu.memory_space<vmem>>, vector<128x128xf32>
    %cst_12 = arith.constant dense<0.000000e+00> : vector<64x128xf32>
    %29 = tpu.matmul %27, %28, %cst_12 {dimension_numbers = #tpu.dot_dimension_numbers<[1], [0], [0], [1], [0, 0, 1, 1], [], []>} : vector<64x128xf32>, vector<128x128xf32>, vector<64x128xf32> -> vector<64x128xf32>
    %c0_13 = arith.constant 0 : index
    %c0_14 = arith.constant 0 : index
    %30 = vector.load %arg5[%c0_13, %c0_14] : memref<1x128xf32, #tpu.memory_space<vmem>>, vector<1x128xf32>
    %31 = vector.broadcast %30 : vector<1x128xf32> to vector<64x128xf32>
    %32 = arith.addf %29, %31 : vector<64x128xf32>
    %33 = arith.addf %0, %32 : vector<64x128xf32>
    %c0_15 = arith.constant 0 : index
    %c0_16 = arith.constant 0 : index
    %34 = vector.load %arg6[%c0_15, %c0_16] : memref<64x128xf32, #tpu.memory_space<vmem>>, vector<64x128xf32>
    tpu.vector_store %arg6[%c0_15, %c0_16], %33 {strides = array<i32>} : memref<64x128xf32, #tpu.memory_space<vmem>>, vector<64x128xf32>,
    return
  }
  func.func @transform_0(%arg0: i32) -> (i32, i32) {
    %c0_i32 = arith.constant 0 : i32
    %c0_i32_0 = arith.constant 0 : i32
    return %arg0, %c0_i32 : i32, i32
  }
  func.func @transform_1(%arg0: i32) -> (i32, i32) {
    %c0_i32 = arith.constant 0 : i32
    %c0_i32_0 = arith.constant 0 : i32
    %c0_i32_1 = arith.constant 0 : i32
    return %c0_i32, %c0_i32_0 : i32, i32
  }
  func.func @transform_2(%arg0: i32) -> (i32, i32) {
    %c0_i32 = arith.constant 0 : i32
    %c0_i32_0 = arith.constant 0 : i32
    %c0_i32_1 = arith.constant 0 : i32
    return %c0_i32, %c0_i32_0 : i32, i32
  }
  func.func @transform_3(%arg0: i32) -> (i32, i32) {
    %c0_i32 = arith.constant 0 : i32
    %c0_i32_0 = arith.constant 0 : i32
    %c0_i32_1 = arith.constant 0 : i32
    return %c0_i32, %c0_i32_0 : i32, i32
  }
  func.func @transform_4(%arg0: i32) -> (i32, i32) {
    %c0_i32 = arith.constant 0 : i32
    %c0_i32_0 = arith.constant 0 : i32
    %c0_i32_1 = arith.constant 0 : i32
    return %c0_i32, %c0_i32_0 : i32, i32
  }
  func.func @transform_5(%arg0: i32) -> (i32, i32) {
    %c0_i32 = arith.constant 0 : i32
    %c0_i32_0 = arith.constant 0 : i32
    return %arg0, %c0_i32 : i32, i32
  }
}

</mosaic_0001>

<bundles_post_ra>
// kernel: tpu_custom_call.1
= control target key start
LH: loop header
LB: loop body
LE: loop exit
PB: predicated region body
PF: predicated region fallthrough
CT: control target
= control target key end

     0   :  { %10 = vsyncpa [#allocation3], 0  ;;  %s1430_s0 = inlined_call_operand.hbm [shape: f32[128,128], index: 0, kind: input, shape index: {}]   ;;  %s1431_s1 = inlined_call_operand.vmem [shape: f32[1,128], index: 1, kind: input, shape index: {}]   ;;  %s1432_s2 = inlined_call_operand.vmem [shape: f32[1,128], index: 2, kind: input, shape index: {}]   ;;  %s1433_s3 = inlined_call_operand.hbm [shape: f32[128,128], index: 3, kind: input, shape index: {}]   ;;  %s1434_s4 = inlined_call_operand.vmem [shape: f32[1,128], index: 4, kind: input, shape index: {}]   ;;  %s1435_s5 = inlined_call_operand.hbm [shape: f32[128,128], index: 5, kind: output, shape index: {}]  }
   0x1   :  { %12 = vsyncpa [#allocation3 + $0x1], 0 }
   0x2   :  { %13 = vsyncpa [#allocation6], 0 }
   0x3   :  { %14 = vsyncpa [#allocation4], 0 }
   0x4   :  { %16 = vsyncpa [#allocation4 + $0x1], 0  ;;  %s1104_s18 = smov 0   ;;  %s1106_s19 = smov 0  }
   0x5   :  { %s1108_s20 = smov 0   ;;  %s1110_s21 = smov 0  }
   0x6 LB: > { %s1125_s22 = sadd.s32 4294967295, %s1065_s21   ;;  %s707_s23 = sadd.s32 4294967294, %s1065_s21   ;;  %s1065_s21 = sphi %s1110_s21, %s1455_s21   ;;  %s1061_s20 = sphi %s1108_s20, %s1454_s20   ;;  %s1057_s19 = sphi %s1106_s19, %s1453_s19   ;;  %s1053_s18 = sphi %s1104_s18, %s1452_s18  }
   0x7   : > { %p42_p0 = scmp.ne.s32.totalorder %s1057_s19, %s1053_s18  ;;  %p1436_p1 = scmp.eq.s32.totalorder %s1125_s22, 0 }
   0x8   : > { %p156_p3 = scmp.eq.s32.totalorder %s707_s23, 1  ;;  %p708_p5 = scmp.ge.s32.totalorder %s1065_s21, 1 }
   0x9   : > { %p1134_p4 = por %p1436_p1, %p42_p0  ;;  %p163_p7 = scmp.lt.s32.totalorder %s1065_s21, 3 }
   0xa   : > { %p1139_p6 = por %p156_p3, %p42_p0  ;;  %s1067_s27 = smov [#allocation5]  }
   0xb   : > { %s1439_s24 = scalar_select %p1134_p4, 1, 0 }
   0xc   : > { %s1440_s25 = scalar_select %p1139_p6, 1, 0 }
   0xd   : > { %p1144_p8 = pnand %p708_p5, %p163_p7  ;;  %s181_s28 = sshll.u32 %s1067_s27, 4  ;;  %s1148_s28 = int_to_ptr.vmem [resolvable:$true] %s181_s28 }
   0xe   : > { %s1160_s30 = sadd.s32 1, %s1065_s21   ;;  %s29_s6 = sadd.s32 1, %s1061_s20 }
   0xf   : > { %s1441_s26 = scalar_select %p1144_p8, 1, 0 }
  0x10   : > { %p852_p9 = pneg %p1144_p8  ;;  %s26_s7 = ssub.s32 %s1065_s21, %s1160_s30 }
  0x11   : > { %s937_s10 = scalar_lea.hbm %s1433_s3, 2048 }
  0x12   : > { %p1155_p11 = pnand %p852_p9, %p1436_p1  ;;  %p938_p12 = scmp.ne.s32.totalorder %s1433_s3, %s937_s10 }
  0x13   : > { %p944_p5 = scmp.lt.u32.totalorder %s937_s10, %s1433_s3 }
  0x14   : > { %p939_p13 = pneg %p1155_p11 }
  0x16   : > { %p940_p0 = pnand %p939_p13, %p938_p12 }
  0x18   : > { %p941_p3 = pneg %p940_p0 }
  0x1a   : > { %p946_p7 = pnand %p944_p5, %p941_p3 }
  0x1c   : > { %949 = shalt.err (!%p946_p7)
}
  0x1d   : > { %s950_s15 = scalar_lea.vmem %s1148_s28, 2048  ;;  %p958_p2 = scmp.lt.s32.totalorder %s1148_s28, %s1148_s28 }
  0x1e   : > { %p951_p9 = scmp.ne.s32.totalorder %s1148_s28, %s950_s15  ;;  %p959_p6 = scmp.lt.s32.totalorder %s950_s15, %s950_s15 }
  0x20   : > { %p953_p10 = pnand %p951_p9, %p939_p13  ;;  %p960_p4 = por %p959_p6, %p958_p2 }
  0x22   : > { %p954_p1 = pneg %p953_p10 }
  0x24   : > { %p961_p8 = pnand %p960_p4, %p954_p1 }
  0x26   : > { %964 = shalt.err (!%p961_p8)
}
  0x27   : > { %s1068_s16 = smov 128   ;;  %s1069_s17 = smov 8  }
  0x28   : > { %855 = dma.hbm_to_vmem [thread:$0]  (!%p1155_p11), %s1433_s3, 2048, %s1148_s28, [#allocation6], %s1068_s16, %s1068_s16, %s1069_s17  }
  0x29   : > { %p27_p1 = scmp.eq.s32.totalorder %s26_s7, 0  ;;  %p36_p2 = scmp.ne.s32.totalorder %s1061_s20, %s1057_s19 }
  0x2a   : > { %p37_p4 = scmp.eq.s32.totalorder %s1065_s21, 0  ;;  %p865_p6 = scmp.lt.s32.totalorder %s1065_s21, 2 }
  0x2b   : > { %s1194_s8 = scalar_select %p27_p1, %s1061_s20, %s29_s6  }
  0x2c   : > { %p38_p8 = por %p37_p4, %p36_p2  ;;  %p1443_p10 = scmp.eq.s32.totalorder %s1125_s22, 1 }
  0x2d   : > { %s198_s29 = sand.u32 1, %s1061_s20   ;;  %s726_s10 = sshll.u32 %s1065_s21, 10 }
  0x2e   : > { %p1198_p12 = por %p1443_p10, %p36_p2  ;;  %s711_s11 = sshll.u32 %s198_s29, 6 }
  0x2f   : > { %s1207_s14 = scalar_lea.hbm %s1430_s0, %s726_s10  ;;  %s202_s28 = scalar_lea.vmem [#allocation2], %s711_s11 }
  0x30   : > { %s209_s6 = sshll.u32 %s202_s28, 4  ;;  %p1209_p11 = pnand %p865_p6, %p38_p8  ;;  %s1213_s6 = int_to_ptr.vmem [resolvable:$true] %s209_s6 }
  0x31   : > { %s1215_s15 = scalar_lea.sflag [#allocation3], %s198_s29  ;;  %s965_s23 = scalar_lea.hbm %s1207_s14, 1024 }
  0x32   : > { %p966_p13 = scmp.ne.s32.totalorder %s1207_s14, %s965_s23  ;;  %p967_p0 = pneg %p1209_p11 }
  0x33   : > { %s970_s11 = scalar_lea.hbm %s1430_s0, 2048  ;;  %p971_p7 = scmp.lt.u32.totalorder %s1207_s14, %s1430_s0 }
  0x34   : > { %p968_p3 = pnand %p967_p0, %p966_p13  ;;  %p972_p9 = scmp.lt.u32.totalorder %s970_s11, %s965_s23 }
  0x35   : > { %p974_p2 = scmp.lt.u32.totalorder %s965_s23, %s1207_s14 }
  0x36   : > { %p969_p5 = pneg %p968_p3  ;;  %p973_p1 = por %p972_p9, %p971_p7 }
  0x38   : > { %p975_p4 = por %p974_p2, %p973_p1 }
  0x3a   : > { %p976_p6 = pnand %p975_p4, %p969_p5 }
  0x3c   : > { %979 = shalt.err (!%p976_p6)
}
  0x3d   : > { %s980_s29 = scalar_lea.vmem %s1213_s6, 1024  ;;  %s1070_s28 = smov [#allocation2]  }
  0x3e   : > { %p981_p8 = scmp.ne.s32.totalorder %s1213_s6, %s980_s29  ;;  %s985_s27 = sshll.u32 %s1070_s28, 4  ;;  %s986_s27 = int_to_ptr.vmem [resolvable:$false] %s985_s27 }
  0x3f   : > { %s987_s10 = scalar_lea.vmem %s986_s27, 2048  ;;  %p988_p3 = scmp.lt.s32.totalorder %s1213_s6, %s986_s27 }
  0x40   : > { %p983_p10 = pnand %p981_p8, %p967_p0  ;;  %p989_p7 = scmp.lt.s32.totalorder %s987_s10, %s980_s29 }
  0x42   : > { %p984_p13 = pneg %p983_p10  ;;  %p990_p9 = por %p989_p7, %p988_p3 }
  0x44   : > { %p991_p1 = pnand %p990_p9, %p984_p13 }
  0x46   : > { %994 = shalt.err (!%p991_p1)
}
  0x47   : > { %859 = dma.hbm_to_vmem [thread:$0]  (!%p1209_p11), %s1207_s14, 1024, %s1213_s6, %s1215_s15, %s1068_s16, %s1068_s16, %s1069_s17  }
  0x48   : > { %p1446_p0 = scmp.ne.s32.totalorder %s1441_s26, 0 }
  0x49   : > { %s1249_s23 = sand.u32 (!%p1446_p0), 1, %s1057_s19   ;;  %p1447_p5 = scmp.ne.s32.totalorder (!%p1446_p0), %s1439_s24, 0 }
  0x4a   : > { %221 = sbr.rel (%p1446_p0) target bundleno = 529 (0x211), region = 40  ;;  %s715_s11 = sshll.u32 (!%p1446_p0), %s1249_s23, 6 }
  0x4b   : > { %s224_s12 = scalar_lea.sflag (!%p1446_p0), [#allocation3], %s1249_s23  ;;  %s227_s7 = scalar_lea.vmem (!%p1446_p0), [#allocation2], %s715_s11 }
  0x51   : > { %1040 = dma.done.wait (%p1447_p5), %s224_s12, 1024  }
  0x52   : > { %1042 = vsyncadd (%p1447_p5), %s224_s12, 4294966272  ;;  %p1448_p11 = scmp.eq.s32.totalorder %s1125_s22, 0 }
  0x54   : > { %1044 = dma.done.wait (%p1448_p11), [#allocation6], 2048   ;;  %p1449_p2 = pmov %p1448_p11 }
  0x55   : > { %v1263_v0 = vld [vmem:[%s227_s7 + $0x8] sm:$0xff]  ;;  %v1265_v1 = vld [vmem:[%s227_s7] sm:$0xff]  ;;  %v1275_v4 = vld [vmem:[%s227_s7 + $0x30] sm:$0xff]  ;;  %s257_s15 = scalar_lea.vmem [#allocation7], %s715_s11  ;;  %s727_s29 = sshll.u32 %s1125_s22, 10 }
  0x56   : > { %1046 = vsyncadd (%p1449_p2), [#allocation6], 4294965248  ;;  %270 = vadd.xlane.f32.xlu1 %v1263_v0  ;;  %268 = vadd.xlane.f32.xlu0 %v1265_v1  ;;  %v1269_v2 = vld [vmem:[%s227_s7 + $0x28] sm:$0xff]  ;;  %v1271_v3 = vld [vmem:[%s227_s7 + $0x20] sm:$0xff]  ;;  %v284_v7 = vmul.f32 %v1265_v1, %v1265_v1  ;;  %v285_v11 = vmul.f32 %v1263_v0, %v1263_v0  ;;  %v290_v12 = vmul.f32 %v1275_v4, %v1275_v4  ;;  %s624_s13 = sshll.u32 %s257_s15, 4  ;;  %s1385_s22 = scalar_lea.hbm %s1435_s5, %s727_s29  ;;  %s1377_s13 = int_to_ptr.vmem [resolvable:$true] %s624_s13 }
  0x57   : > { %v1277_v5 = vld [vmem:[%s227_s7 + $0x10] sm:$0xff]  ;;  %v288_v6 = vmul.f32 %v1271_v3, %v1271_v3  ;;  %v1285_v8 = vld [vmem:[%s227_s7 + $0x38] sm:$0xff]  ;;  %v289_v10 = vmul.f32 %v1269_v2, %v1269_v2  ;;  %v466_v16 = vld [vmem:[#allocation5] sm:$0xff]  ;;  %s611_s10 = scalar_lea.sflag [#allocation4], %s1249_s23  ;;  %s995_s11 = scalar_lea.vmem %s1377_s13, 1024 }
  0x58   : > { %v1287_v9 = vld [vmem:[%s227_s7 + $0x18] sm:$0xff]  ;;  %v286_v13 = vmul.f32 %v1277_v5, %v1277_v5  ;;  %v291_v14 = vmul.f32 %v1285_v8, %v1285_v8  ;;  %v467_v17 = vld [vmem:[#allocation5 + $0x8] sm:$0xff]  ;;  %v468_v19 = vld [vmem:[#allocation5 + $0x10] sm:$0xff]  ;;  %p996_p4 = scmp.ne.s32.totalorder %s1377_s13, %s995_s11  ;;  %s1071_s12 = smov [#allocation7]  }
  0x59   : > { %v287_v15 = vmul.f32 %v1287_v9, %v1287_v9  ;;  %v796_v18 = vpack.c.bf16 %v467_v17, %v466_v16  ;;  %v469_v20 = vld [vmem:[#allocation5 + $0x18] sm:$0xff]  ;;  %v470_v22 = vld [vmem:[#allocation5 + $0x20] sm:$0xff]  ;;  %v471_v23 = vld [vmem:[#allocation5 + $0x28] sm:$0xff]  ;;  %s999_s7 = sshll.u32 %s1071_s12, 4  ;;  %s1000_s7 = int_to_ptr.vmem [resolvable:$false] %s999_s7 }
  0x5a   : > { %278 = vadd.xlane.f32.xlu1 %v1269_v2  ;;  %276 = vadd.xlane.f32.xlu0 %v1271_v3  ;;  %v800_v21 = vpack.c.bf16 %v469_v20, %v468_v19  ;;  %v804_v24 = vpack.c.bf16 %v471_v23, %v470_v22  ;;  %v472_v25 = vld [vmem:[#allocation5 + $0x30] sm:$0xff]  ;;  %v473_v26 = vld [vmem:[#allocation5 + $0x38] sm:$0xff]  ;;  %v474_v28 = vld [vmem:[#allocation5 + $0x40] sm:$0xff]  ;;  %p997_p6 = pnand %p996_p4, %p1198_p12  ;;  %s1001_s24 = scalar_lea.vmem %s1000_s7, 2048 }
  0x5b   : > { %797 = vmatprep.subr.bf16.mxu0 %v796_v18  ;;  %828 = vmatprep.subr.bf16.mxu1 %v796_v18  ;;  %v808_v27 = vpack.c.bf16 %v473_v26, %v472_v25  ;;  %v475_v29 = vld [vmem:[#allocation5 + $0x48] sm:$0xff]  ;;  %v476_v31 = vld [vmem:[#allocation5 + $0x50] sm:$0xff]  ;;  %v477_v32 = vld [vmem:[#allocation5 + $0x58] sm:$0xff]  ;;  %p1002_p10 = scmp.lt.s32.totalorder %s1377_s13, %s1000_s7  ;;  %p1003_p13 = scmp.lt.s32.totalorder %s1001_s24, %s995_s11 }
  0x5c   : > { %799 = vmatpush3.bf16.msra.mxu0 %v796_v18  ;;  %836 = vmatpush3.bf16.msra.mxu1 %v796_v18  ;;  %v812_v30 = vpack.c.bf16 %v475_v29, %v474_v28  ;;  %v816_v33 = vpack.c.bf16 %v477_v32, %v476_v31  ;;  %v478_v34 = vld [vmem:[#allocation5 + $0x60] sm:$0xff]  ;;  %v479_v35 = vld [vmem:[#allocation5 + $0x68] sm:$0xff]  ;;  %v480_v37 = vld [vmem:[#allocation5 + $0x70] sm:$0xff]  ;;  %p998_p8 = pneg %p997_p6 }
  0x5d   : > { %801 = vmatprep.subr.bf16.mxu0 %v800_v21  ;;  %829 = vmatprep.subr.bf16.mxu1 %v800_v21  ;;  %v820_v36 = vpack.c.bf16 %v479_v35, %v478_v34  ;;  %v481_v38 = vld [vmem:[#allocation5 + $0x78] sm:$0xff]  ;;  %p1004_p3 = por %p1003_p13, %p1002_p10 }
  0x5e   : > { %280 = vadd.xlane.f32.xlu1 %v1275_v4  ;;  %272 = vadd.xlane.f32.xlu0 %v1277_v5  ;;  %v824_v39 = vpack.c.bf16 %v481_v38, %v480_v37 }
  0x5f   : > { %p1005_p7 = pnand %p1004_p3, %p998_p8 }
  0x60   : > { %803 = vmatpush3.bf16.msra.mxu0 %v800_v21  ;;  %837 = vmatpush3.bf16.msra.mxu1 %v800_v21 }
  0x61   : > { %805 = vmatprep.subr.bf16.mxu0 %v804_v24  ;;  %830 = vmatprep.subr.bf16.mxu1 %v804_v24 }
  0x62   : > { %300 = vadd.xlane.f32.xlu1 %v288_v6  ;;  %292 = vadd.xlane.f32.xlu0 %v284_v7 }
  0x64   : > { %807 = vmatpush3.bf16.msra.mxu0 %v804_v24  ;;  %838 = vmatpush3.bf16.msra.mxu1 %v804_v24 }
  0x65   : > { %809 = vmatprep.subr.bf16.mxu0 %v808_v27  ;;  %831 = vmatprep.subr.bf16.mxu1 %v808_v27 }
  0x66   : > { %282 = vadd.xlane.f32.xlu1 %v1285_v8  ;;  %274 = vadd.xlane.f32.xlu0 %v1287_v9 }
  0x68   : > { %811 = vmatpush3.bf16.msra.mxu0 %v808_v27  ;;  %839 = vmatpush3.bf16.msra.mxu1 %v808_v27 }
  0x69   : > { %813 = vmatprep.subr.bf16.mxu0 %v812_v30  ;;  %832 = vmatprep.subr.bf16.mxu1 %v812_v30 }
  0x6a   : > { %302 = vadd.xlane.f32.xlu1 %v289_v10  ;;  %294 = vadd.xlane.f32.xlu0 %v285_v11 }
  0x6c   : > { %815 = vmatpush3.bf16.msra.mxu0 %v812_v30  ;;  %840 = vmatpush3.bf16.msra.mxu1 %v812_v30 }
  0x6d   : > { %817 = vmatprep.subr.bf16.mxu0 %v816_v33  ;;  %833 = vmatprep.subr.bf16.mxu1 %v816_v33 }
  0x6e   : > { %304 = vadd.xlane.f32.xlu1 %v290_v12  ;;  %296 = vadd.xlane.f32.xlu0 %v286_v13 }
  0x70   : > { %819 = vmatpush3.bf16.msra.mxu0 %v816_v33  ;;  %841 = vmatpush3.bf16.msra.mxu1 %v816_v33 }
  0x71   : > { %821 = vmatprep.subr.bf16.mxu0 %v820_v36  ;;  %834 = vmatprep.subr.bf16.mxu1 %v820_v36 }
  0x72   : > { %306 = vadd.xlane.f32.xlu1 %v291_v14  ;;  %298 = vadd.xlane.f32.xlu0 %v287_v15 }
  0x74   : > { %823 = vmatpush3.bf16.msra.mxu0 %v820_v36  ;;  %842 = vmatpush3.bf16.msra.mxu1 %v820_v36 }
  0x75   : > { %825 = vmatprep.subr.bf16.mxu0 %v824_v39  ;;  %835 = vmatprep.subr.bf16.mxu1 %v824_v39 }
  0x78   : > { %827 = vmatpush3.bf16.msra.mxu0 %v824_v39  ;;  %843 = vmatpush3.bf16.msra.mxu1 %v824_v39 }
  0xe3   : > { %v271_v40 = vpop.xlane.xlu1 %270  ;;  %v269_v41 = vpop.xlane.xlu0 %268 }
  0xe4   : > { %v1303_v44 = vmul.f32 0.0078125, %v269_v41  ;;  %v1309_v54 = vmul.f32 0.0078125, %v271_v40 }
  0xe6   : > { %v316_v48 = vmul.f32 %v1303_v44, %v269_v41  ;;  %v317_v6 = vmul.f32 %v1309_v54, %v271_v40 }
  0xe7   : > { %v279_v42 = vpop.xlane.xlu1 %278  ;;  %v277_v43 = vpop.xlane.xlu0 %276 }
  0xe8   : > { %v1305_v45 = vmul.f32 0.0078125, %v277_v43  ;;  %v1311_v55 = vmul.f32 0.0078125, %v279_v42 }
  0xea   : > { %v320_v49 = vmul.f32 %v1305_v45, %v277_v43  ;;  %v321_v7 = vmul.f32 %v1311_v55, %v279_v42 }
  0xeb   : > { %v281_v46 = vpop.xlane.xlu1 %280  ;;  %v273_v47 = vpop.xlane.xlu0 %272 }
  0xec   : > { %v1313_v62 = vmul.f32 0.0078125, %v281_v46  ;;  %v1315_v63 = vmul.f32 0.0078125, %v273_v47 }
  0xee   : > { %v322_v14 = vmul.f32 %v1313_v62, %v281_v46  ;;  %v318_v15 = vmul.f32 %v1315_v63, %v273_v47 }
  0xef   : > { %v301_v50 = vpop.xlane.xlu1 %300  ;;  %v293_v51 = vpop.xlane.xlu0 %292 }
  0xf0   : > { %v328_v52 = vsub.f32 %v301_v50, %v320_v49  ;;  %v324_v53 = vsub.f32 %v293_v51, %v316_v48 }
  0xf2   : > { %v336_v56 = vmax.f32 %v328_v52, 0.0  ;;  %v332_v57 = vmax.f32 %v324_v53, 0.0 }
  0xf3   : > { %v283_v58 = vpop.xlane.xlu1 %282  ;;  %v275_v59 = vpop.xlane.xlu0 %274 }
  0xf4   : > { %v344_v60 = vmul.f32 0.007874016, %v336_v56  ;;  %v340_v61 = vmul.f32 0.007874016, %v332_v57  ;;  %v1321_v16 = vmul.f32 0.0078125, %v283_v58  ;;  %v1323_v17 = vmul.f32 0.0078125, %v275_v59 }
  0xf6   : > { %905 = vrsqrt.f32 %v344_v60  ;;  %v323_v26 = vmul.f32 %v1321_v16, %v283_v58  ;;  %v319_v27 = vmul.f32 %v1323_v17, %v275_v59  ;;  %vm378_vm0 = vcmp.eq.f32.partialorder %v344_v60, inf }
  0xf7   : > { %907 = vrsqrt.f32 %v340_v61  ;;  %v303_v10 = vpop.xlane.xlu1 %302  ;;  %v295_v11 = vpop.xlane.xlu0 %294  ;;  %v381_v43 = vand.u32 2147483648, %v344_v60  ;;  %vm350_vm1 = vcmp.eq.f32.partialorder %v340_v61, inf  ;;  %v353_v46 = vand.u32 2147483648, %v340_v61 }
  0xf8   : > { %v329_v12 = vsub.f32 %v303_v10, %v321_v7  ;;  %v325_v13 = vsub.f32 %v295_v11, %v317_v6  ;;  %vm352_vm2 = vcmp.eq.f32.partialorder %v340_v61, 0.0  ;;  %vm380_vm3 = vcmp.eq.f32.partialorder %v344_v60, 0.0 }
  0xfa   : > { %v337_v18 = vmax.f32 %v329_v12, 0.0  ;;  %v333_v19 = vmax.f32 %v325_v13, 0.0 }
  0xfb   : > { %v305_v20 = vpop.xlane.xlu1 %304  ;;  %v297_v21 = vpop.xlane.xlu0 %296 }
  0xfc   : > { %v345_v22 = vmul.f32 0.007874016, %v337_v18  ;;  %v341_v23 = vmul.f32 0.007874016, %v333_v19  ;;  %v330_v24 = vsub.f32 %v305_v20, %v322_v14  ;;  %v326_v25 = vsub.f32 %v297_v21, %v318_v15 }
  0xfd   : > { %v420_v18 = vsub.f32 %v1265_v1, %v1303_v44  ;;  %v424_v19 = vsub.f32 %v1271_v3, %v1305_v45 }
  0xfe   : > { %909 = vrsqrt.f32 %v345_v22  ;;  %v338_v31 = vmax.f32 %v330_v24, 0.0  ;;  %v334_v32 = vmax.f32 %v326_v25, 0.0  ;;  %vm385_vm4 = vcmp.eq.f32.partialorder %v345_v22, inf }
  0xff   : > { %911 = vrsqrt.f32 %v341_v23  ;;  %v307_v28 = vpop.xlane.xlu1 %306  ;;  %v299_v29 = vpop.xlane.xlu0 %298  ;;  %v388_v58 = vand.u32 2147483648, %v345_v22  ;;  %vm387_vm5 = vcmp.eq.f32.partialorder %v345_v22, 0.0  ;;  %vm357_vm6 = vcmp.eq.f32.partialorder %v341_v23, inf }
 0x100   : > { %v906_v30 = vpop.eup %905  ;;  %v331_v33 = vsub.f32 %v307_v28, %v323_v26  ;;  %v327_v34 = vsub.f32 %v299_v29, %v319_v27  ;;  %v346_v38 = vmul.f32 0.007874016, %v338_v31  ;;  %v342_v39 = vmul.f32 0.007874016, %v334_v32 }
 0x101   : > { %v908_v35 = vpop.eup %907  ;;  %v377_v36 = vmul.f32 %v906_v30, %v344_v60  ;;  %v360_v7 = vand.u32 2147483648, %v341_v23  ;;  %vm359_vm7 = vcmp.eq.f32.partialorder %v341_v23, 0.0 }
 0x102   : > { %v349_v37 = vmul.f32 %v908_v35, %v340_v61  ;;  %v339_v40 = vmax.f32 %v331_v33, 0.0  ;;  %v335_v41 = vmax.f32 %v327_v34, 0.0  ;;  %913 = vrsqrt.f32 %v346_v38  ;;  %v718_v33 = vld [vmem:[%s1431_s1] ss:$0 sm:$0xff] }
 0x103   : > { %v379_v42 = vsel %vm378_vm0, %v344_v60, %v377_v36  ;;  %915 = vrsqrt.f32 %v342_v39  ;;  %vm392_vm8 = vcmp.eq.f32.partialorder %v346_v38, inf  ;;  %v395_v21 = vand.u32 2147483648, %v346_v38 }
 0x104   : > { %v1327_v47 = vmul.f32 0.007874016, %v339_v40  ;;  %v1329_v48 = vmul.f32 0.007874016, %v335_v41  ;;  %v351_v49 = vsel %vm350_vm1, %v340_v61, %v349_v37  ;;  %v382_v50 = vsel %vm380_vm3, %v381_v43, %v379_v42  ;;  %v719_v40 = vld [vmem:[%s1432_s2] ss:$0 sm:$0xff] }
 0x105   : > { %v354_v51 = vsel %vm352_vm2, %v353_v46, %v351_v49  ;;  %v408_v52 = vadd.f32 1e-06, %v382_v50  ;;  %vm394_vm9 = vcmp.eq.f32.partialorder %v346_v38, 0.0  ;;  %vm364_vm10 = vcmp.eq.f32.partialorder %v342_v39, inf }
 0x106   : > { %917 = vrsqrt.f32 %v1327_v47  ;;  %v404_v6 = vadd.f32 1e-06, %v354_v51  ;;  %v367_v24 = vand.u32 2147483648, %v342_v39  ;;  %vm366_vm11 = vcmp.eq.f32.partialorder %v342_v39, 0.0 }
 0x107   : > { %919 = vrsqrt.f32 %v1329_v48  ;;  %vm399_vm12 = vcmp.eq.f32.partialorder %v1327_v47, inf  ;;  %vm401_vm13 = vcmp.eq.f32.partialorder %v1327_v47, 0.0  ;;  %v402_v31 = vand.u32 2147483648, %v1327_v47 }
 0x108   : > { %v910_v53 = vpop.eup %909  ;;  %921 = vrcp.f32 %v408_v52  ;;  %vm371_vm14 = vcmp.eq.f32.partialorder %v1329_v48, inf  ;;  %v374_v36 = vand.u32 2147483648, %v1329_v48  ;;  %vm373_vm15 = vcmp.eq.f32.partialorder %v1329_v48, 0.0 }
 0x109   : > { %v912_v56 = vpop.eup %911  ;;  %v384_v57 = vmul.f32 %v910_v53, %v345_v22  ;;  %923 = vrcp.f32 %v404_v6  ;;  %v425_v50 = vsub.f32 %v1269_v2, %v1311_v55  ;;  %v426_v55 = vsub.f32 %v1275_v4, %v1313_v62 }
 0x10a   : > { %v356_v59 = vmul.f32 %v912_v56, %v341_v23 }
 0x10b   : > { %v386_v60 = vsel %vm385_vm4, %v345_v22, %v384_v57 }
 0x10c   : > { %v358_v61 = vsel %vm357_vm6, %v341_v23, %v356_v59  ;;  %v389_v10 = vsel %vm387_vm5, %v388_v58, %v386_v60  ;;  %v914_v13 = vpop.eup %913 }
 0x10d   : > { %v361_v11 = vsel %vm359_vm7, %v360_v7, %v358_v61  ;;  %v409_v12 = vadd.f32 1e-06, %v389_v10  ;;  %v916_v15 = vpop.eup %915  ;;  %v391_v20 = vmul.f32 %v914_v13, %v346_v38 }
 0x10e   : > { %v405_v14 = vadd.f32 1e-06, %v361_v11  ;;  %v363_v22 = vmul.f32 %v916_v15, %v342_v39 }
 0x10f   : > { %925 = vrcp.f32 %v409_v12  ;;  %v393_v23 = vsel %vm392_vm8, %v346_v38, %v391_v20 }
 0x110   : > { %927 = vrcp.f32 %v405_v14  ;;  %v918_v25 = vpop.eup %917  ;;  %v365_v26 = vsel %vm364_vm10, %v342_v39, %v363_v22  ;;  %v396_v27 = vsel %vm394_vm9, %v395_v21, %v393_v23  ;;  %v427_v14 = vsub.f32 %v1285_v8, %v1321_v16  ;;  %v720_v16 = vld [vmem:[%s1434_s4] ss:$0 sm:$0xff] }
 0x111   : > { %v920_v44 = vpop.eup %919  ;;  %v398_v28 = vmul.f32 %v918_v25, %v1327_v47  ;;  %v368_v45 = vsel %vm366_vm11, %v367_v24, %v365_v26  ;;  %v410_v29 = vadd.f32 1e-06, %v396_v27 }
 0x112   : > { %v922_v30 = vpop.eup %921  ;;  %v370_v32 = vmul.f32 %v920_v44, %v1329_v48  ;;  %v406_v34 = vadd.f32 1e-06, %v368_v45 }
 0x113   : > { %v400_v35 = vsel %vm399_vm12, %v1327_v47, %v398_v28  ;;  %v432_v37 = vmul.f32 %v922_v30, %v424_v19  ;;  %929 = vrcp.f32 %v410_v29  ;;  %v924_v38 = vpop.eup %923  ;;  %v423_v19 = vsub.f32 %v1287_v9, %v1323_v17 }
 0x114   : > { %v372_v39 = vsel %vm371_vm14, %v1329_v48, %v370_v32  ;;  %931 = vrcp.f32 %v406_v34  ;;  %v403_v41 = vsel %vm401_vm13, %v402_v31, %v400_v35  ;;  %v428_v42 = vmul.f32 %v924_v38, %v420_v18 }
 0x115   : > { %v447_v43 = vmul.f32 %v718_v33, %v432_v37  ;;  %v375_v46 = vsel %vm373_vm15, %v374_v36, %v372_v39  ;;  %v411_v49 = vadd.f32 1e-06, %v403_v41  ;;  %v421_v48 = vsub.f32 %v1263_v0, %v1309_v54 }
 0x116   : > { %v407_v51 = vadd.f32 1e-06, %v375_v46  ;;  %v443_v53 = vmul.f32 %v718_v33, %v428_v42  ;;  %v422_v54 = vsub.f32 %v1277_v5, %v1315_v63 }
 0x117   : > { %v462_v56 = vadd.f32 %v719_v40, %v447_v43  ;;  %933 = vrcp.f32 %v411_v49 }
 0x118   : > { %935 = vrcp.f32 %v407_v51  ;;  %v458_v47 = vadd.f32 %v719_v40, %v443_v53 }
 0x119   : > { %v926_v52 = vpop.eup %925  ;;  %790 = vmatprep.mubr.f32.mxu1 %v462_v56 }
 0x11a   : > { %v928_v57 = vpop.eup %927  ;;  %v433_v58 = vmul.f32 %v926_v52, %v425_v50  ;;  %784 = vmatprep.mubr.f32.mxu0 %v458_v47 }
 0x11b   : > { %v429_v59 = vmul.f32 %v928_v57, %v421_v48 }
 0x11c   : > { %v448_v6 = vmul.f32 %v718_v33, %v433_v58 }
 0x11d   : > { %v444_v60 = vmul.f32 %v718_v33, %v429_v59  ;;  %v930_v61 = vpop.eup %929 }
 0x11e   : > { %v463_v7 = vadd.f32 %v719_v40, %v448_v6  ;;  %v932_v11 = vpop.eup %931  ;;  %v434_v12 = vmul.f32 %v930_v61, %v426_v55 }
 0x11f   : > { %v459_v10 = vadd.f32 %v719_v40, %v444_v60  ;;  %v430_v13 = vmul.f32 %v932_v11, %v422_v54 }
 0x120   : > { %791 = vmatmul.mubr.f32.vlgmr.msra.gmra.mrb[0].mxu1 %v463_v7  ;;  %v449_v15 = vmul.f32 %v718_v33, %v434_v12 }
 0x121   : > { %785 = vmatmul.mubr.f32.vlgmr.msra.gmra.mrb[0].mxu0 %v459_v10  ;;  %v934_v18 = vpop.eup %933  ;;  %v445_v62 = vmul.f32 %v718_v33, %v430_v13 }
 0x122   : > { %v936_v20 = vpop.eup %935  ;;  %v464_v21 = vadd.f32 %v719_v40, %v449_v15  ;;  %v435_v22 = vmul.f32 %v934_v18, %v427_v14 }
 0x123   : > { %v460_v23 = vadd.f32 %v719_v40, %v445_v62  ;;  %v431_v63 = vmul.f32 %v936_v20, %v423_v19 }
 0x124   : > { %793 = vmatprep.mubr.f32.mxu1 %v464_v21  ;;  %v450_v24 = vmul.f32 %v718_v33, %v435_v22 }
 0x125   : > { %787 = vmatprep.mubr.f32.mxu0 %v460_v23  ;;  %v446_v25 = vmul.f32 %v718_v33, %v431_v63 }
 0x126   : > { %v465_v26 = vadd.f32 %v719_v40, %v450_v24 }
 0x127   : > { %v461_v27 = vadd.f32 %v719_v40, %v446_v25 }
 0x128   : > { %794 = vmatmul.mubr.f32.gmra.mrb[2].mxu1 %v465_v26 }
 0x129   : > { %788 = vmatmul.mubr.f32.gmra.mrb[2].mxu0 %v461_v27 }
 0x1f3   : > { %v792_v17 = vpop.f32.mrb[0].mxu1 }
 0x1f4   : > { %v786_v44 = vpop.f32.mrb[0].mxu0  ;;  %v581_v28 = vadd.f32 %v792_v17, %v720_v16  ;;  %v575_v45 = vpop.f32.mrb[1].mxu1 }
 0x1f5   : > { %v561_v29 = vadd.f32 %v786_v44, %v720_v16  ;;  %v555_v30 = vpop.f32.mrb[1].mxu0  ;;  %v576_v31 = vadd.f32 %v720_v16, %v575_v45 }
 0x1f6   : > { %v599_v32 = vadd.f32 %v581_v28, %v1269_v2  ;;  %v556_v33 = vadd.f32 %v720_v16, %v555_v30 }
 0x1f7   : > { %v595_v34 = vadd.f32 %v561_v29, %v1263_v0  ;;  %v598_v35 = vadd.f32 %v576_v31, %v1271_v3 }
 0x1f8   : > { %607 = vst [vmem:[%s257_s15 + $0x28] sm:$0xff] %v599_v32  ;;  %v594_v36 = vadd.f32 %v556_v33, %v1265_v1 }
 0x1f9   : > { %603 = vst [vmem:[%s257_s15 + $0x8] sm:$0xff] %v595_v34  ;;  %606 = vst [vmem:[%s257_s15 + $0x20] sm:$0xff] %v598_v35 }
 0x1fa   : > { %602 = vst [vmem:[%s257_s15] sm:$0xff] %v594_v36 }
 0x1fb   : > { %v795_v37 = vpop.f32.mrb[2].mxu1 }
 0x1fc   : > { %v789_v38 = vpop.f32.mrb[2].mxu0  ;;  %v591_v39 = vadd.f32 %v795_v37, %v720_v16  ;;  %v585_v40 = vpop.f32.mrb[3].mxu1 }
 0x1fd   : > { %v571_v2 = vadd.f32 %v789_v38, %v720_v16  ;;  %v565_v41 = vpop.f32.mrb[3].mxu0  ;;  %v586_v0 = vadd.f32 %v720_v16, %v585_v40 }
 0x1fe   : > { %v601_v1 = vadd.f32 %v591_v39, %v1285_v8  ;;  %v566_v3 = vadd.f32 %v720_v16, %v565_v41 }
 0x1ff   : > { %v597_v42 = vadd.f32 %v571_v2, %v1287_v9  ;;  %v600_v43 = vadd.f32 %v586_v0, %v1275_v4 }
 0x200   : > { %609 = vst [vmem:[%s257_s15 + $0x38] sm:$0xff] %v601_v1  ;;  %v596_v46 = vadd.f32 %v566_v3, %v1277_v5 }
 0x201   : > { %605 = vst [vmem:[%s257_s15 + $0x18] sm:$0xff] %v597_v42  ;;  %608 = vst [vmem:[%s257_s15 + $0x30] sm:$0xff] %v600_v43 }
 0x202   : > { %604 = vst [vmem:[%s257_s15 + $0x10] sm:$0xff] %v596_v46 }
 0x203   : > { %1008 = shalt.err (!%p1005_p7)
}
 0x204   : > { %s1009_s26 = scalar_lea.hbm %s1385_s22, 1024  ;;  %s1013_s14 = scalar_lea.hbm %s1435_s5, 2048 }
 0x205   : > { %p1010_p9 = scmp.ne.s32.totalorder %s1385_s22, %s1009_s26  ;;  %p1014_p5 = scmp.lt.u32.totalorder %s1385_s22, %s1435_s5 }
 0x206   : > { %p1015_p11 = scmp.lt.u32.totalorder %s1013_s14, %s1009_s26  ;;  %p1017_p4 = scmp.lt.u32.totalorder %s1009_s26, %s1385_s22 }
 0x207   : > { %p1011_p1 = pnand %p1010_p9, %p1198_p12 }
 0x208   : > { %p1016_p2 = por %p1015_p11, %p1014_p5 }
 0x209   : > { %p1012_p0 = pneg %p1011_p1 }
 0x20a   : > { %p1018_p6 = por %p1017_p4, %p1016_p2 }
 0x20c   : > { %p1019_p8 = pnand %p1018_p6, %p1012_p0 }
 0x20e   : > { %1022 = shalt.err (!%p1019_p8)
}
 0x20f   : > { %s1072_s29 = smov 128   ;;  %s1073_s28 = smov 8  }
 0x210   : > { %850 = dma.vmem_to_hbm [thread:$0]  (%p1198_p12), %s1377_s13, 1024, %s1385_s22, %s611_s10, %s1072_s29, %s1072_s29, %s1073_s28  }
 0x211 PF: > { %s639_s27 = sand.u32 1, %s1053_s18   ;;  %p1450_p10 = scmp.ne.s32.totalorder %s1440_s25, 0 }
 0x212   : > { %p1451_p13 = scmp.ge.s32.totalorder %s1065_s21, 2  ;;  %s640_s11 = scalar_lea.sflag [#allocation4], %s639_s27 }
 0x214   : > { %p861_p3 = pnand %p1451_p13, %p1450_p10 }
 0x216   : > { %1048 = dma.done.wait (!%p861_p3), %s640_s11, 1024  }
 0x217   : > { %1050 = vsyncadd (!%p861_p3), %s640_s11, 4294966272  ;;  %p19_p7 = scmp.ge.s32.totalorder %s1160_s30, 4   ;;  %s1452_s18 = smov %s1057_s19 }
 0x218   : > { %s1453_s19 = smov %s1061_s20  ;;  %s1454_s20 = smov %s1194_s8 }
 0x219   : > { %s1455_s21 = smov %s1160_s30  ;;  %21 = sbr.rel (!%p19_p7) target bundleno = 6 (0x6), region = 89 }
 0x220   :  { %645 = vsyncpa [#allocation3], 1 }
 0x221   :  { %647 = vsyncpa [#allocation3 + $0x1], 1 }
 0x222   :  { %648 = vsyncpa [#allocation6], 1 }
 0x223   :  { %649 = vsyncpa [#allocation4], 1 }
 0x224   :  { %651 = vsyncpa [#allocation4 + $0x1], 1 }

</bundles_post_ra>
